<compile_context>
chip_gen: v7x
topology: tpu7x:2x2x1
jax: 0.10.0
libtpu: 0.0.40
codegen_flags: <defaults>
</compile_context>

<pallas_src>
import math
import jax
import jax.numpy as jnp
from jax.experimental import pallas as pl
from jax.experimental.pallas import tpu as pltpu

# ---------------- config (small, consistent with the module) ----------------
BATCH = 2
SEQ = 8
HIDDEN = 32
NUM_HEADS = 4
HEAD_DIM = HIDDEN // NUM_HEADS
EPS = 1e-6  # TODO(synk): KernelAttentionProduct's exact eps constant is not in the snippet; 1e-6 used.

# Batches processed per grid step; chosen so the fused RHS is exactly 128 lanes wide
# (2 * BATCH_TILE * HIDDEN = 128) and the single q-matmul fills the full lane width.
BATCH_TILE = 2


def _elu_plus_one(x):
    # F.elu(x) + 1 (alpha=1): x>0 -> x+1 ; x<=0 -> exp(x).
    # exp(min(x, 0)) keeps a future VJP free of inf*0 -> NaN (forward values unchanged).
    return jnp.where(x > 0, x + 1.0, jnp.exp(jnp.minimum(x, 0.0)))


def _head_block_mask():
    # Static [H, H] block-diagonal mask: 1 iff row/col feature dims belong to the same head.
    idx = jnp.arange(HIDDEN) // HEAD_DIM
    return (idx[:, None] == idx[None, :]).astype(jnp.float32)


def kernel_self_attention_kernel(x_ref, w_ref, b_ref, mask_ref, o_ref):
    # x_ref:    [BATCH_TILE*S, H]  rows of BATCH_TILE full sequences
    # w_ref:    [3, H, H]          stacked pre-transposed (Wq^T, Wk^T, Wv^T)
    # b_ref:    [3, 1, H]          stacked (bq, bk, bv)
    # mask_ref: [H, 2*BATCH_TILE*H]  block-diagonal head mask tiled along lanes
    # o_ref:    [BATCH_TILE*S, H]
    x = x_ref[...]

    # Three lane-aligned projections (leading-axis ref indexing = address offset only).
    q = _elu_plus_one(jnp.dot(x, w_ref[0], preferred_element_type=jnp.float32) + b_ref[0])
    k = _elu_plus_one(jnp.dot(x, w_ref[1], preferred_element_type=jnp.float32) + b_ref[1])
    v = jnp.dot(x, w_ref[2], preferred_element_type=jnp.float32) + b_ref[2]

    ones_sh = jnp.ones((SEQ, HIDDEN), jnp.float32)

    # Per batch: ONE transpose-LHS MXU op gives [KV | k_sum-broadcast]:
    #   (k_b^T @ [v_b | 1])[d, :H]  = KV_b[d, e]          = sum_s k[s,d] v[s,e]
    #   (k_b^T @ [v_b | 1])[d, H:]  = k_sum_b[d] (all e)  = sum_s k[s,d]
    blocks = []
    for b in range(BATCH_TILE):
        lo = b * SEQ
        k_b = k[lo:lo + SEQ]                                   # sublane slice (cheap)
        v_b = v[lo:lo + SEQ]
        v_ext = jnp.concatenate([v_b, ones_sh], axis=1)        # [S, 2H]; ones are a constant splat
        kv_ext = jax.lax.dot_general(
            k_b, v_ext, (((0,), (0,)), ((), ())),              # contract LHS dim 0 -> MXU transpose-lhs path
            preferred_element_type=jnp.float32)                # [H, 2H]
        blocks.append(kv_ext)

    # [H, 2*BATCH_TILE*H] = [32, 128]; one elementwise multiply applies the per-head
    # block-diagonal mask to every KV block and every k_sum (denominator) block.
    rhs = jnp.concatenate(blocks, axis=1) * mask_ref[...]

    # Single full-lane-width MXU op: [BATCH_TILE*S, H] x [H, 2*BATCH_TILE*H] = [16,32]x[32,128].
    res = jnp.dot(q, rhs, preferred_element_type=jnp.float32)

    # Row group b reads its own 64-lane block: num = lanes [2bH, 2bH+H), den = next H lanes.
    for b in range(BATCH_TILE):
        lo = b * SEQ
        num = res[lo:lo + SEQ, 2 * b * HIDDEN:(2 * b + 1) * HIDDEN]
        den = res[lo:lo + SEQ, (2 * b + 1) * HIDDEN:(2 * b + 2) * HIDDEN]
        o_ref[lo:lo + SEQ, :] = (num / (den + EPS)).astype(o_ref.dtype)


def prepare_params(wq, bq, wk, bk, wv, bv):
    """One-time 'model setup': stack pre-transposed weights / biases and build the
    lane-tiled head mask. Done once, not per call."""
    w3 = jnp.stack([wq.T, wk.T, wv.T], axis=0)            # [3, H, H]
    b3 = jnp.stack([bq, bk, bv], axis=0)[:, None, :]      # [3, 1, H]
    mask4 = jnp.tile(_head_block_mask(), (1, 2 * BATCH_TILE))   # [H, 2*BATCH_TILE*H] = [32, 128]
    return w3, b3, mask4


def kernel_self_attention(x, w3, b3, mask4):
    """x: [B, S, H] f32.  w3: [3, H, H] pre-transposed.  b3: [3, 1, H].  mask4: [H, 2*BT*H]."""
    B, S, H = x.shape
    assert S == SEQ and H == HIDDEN and B % BATCH_TILE == 0
    x2d = x.reshape(B * S, H)                 # batch folded into sublane rows
    rows_per_block = BATCH_TILE * SEQ
    n_blocks = B // BATCH_TILE                # == 1 at toy size; "parallel" axis when B grows

    out2d = pl.pallas_call(
        kernel_self_attention_kernel,
        out_shape=jax.ShapeDtypeStruct((B * S, H), x.dtype),
        grid_spec=pltpu.PrefetchScalarGridSpec(
            num_scalar_prefetch=0,
            grid=(n_blocks,),
            in_specs=[
                pl.BlockSpec((rows_per_block, H), lambda i: (i, 0)),              # x rows
                pl.BlockSpec((3, H, H), lambda i: (0, 0, 0)),                     # stacked W^T
                pl.BlockSpec((3, 1, H), lambda i: (0, 0, 0)),                     # stacked b
                pl.BlockSpec((H, 2 * BATCH_TILE * H), lambda i: (0, 0)),          # head mask (hoisted)
            ],
            out_specs=pl.BlockSpec((rows_per_block, H), lambda i: (i, 0)),
        ),
        compiler_params=pltpu.CompilerParams(dimension_semantics=("parallel",)),
    )(x2d, w3, b3, mask4)

    return out2d.reshape(B, S, H)


def reference_jax(x, wq, bq, wk, bk, wv, bv):
    """Plain-JAX reference mirroring the PyTorch forward (mask=None, eval)."""
    B, S, H = x.shape

    def proj(w, b):
        return x @ w.T + b

    def heads(t):  # [B,S,H] -> [B,nh,S,d]
        return t.reshape(B, S, NUM_HEADS, HEAD_DIM).transpose(0, 2, 1, 3)

    q = _elu_plus_one(heads(proj(wq, bq)))
    k = _elu_plus_one(heads(proj(wk, bk)))
    v = heads(proj(wv, bv))
    kv = jnp.einsum('bhsd,bhse->bhde', k, v)
    k_sum = jnp.sum(k, axis=2)                                   # [B,nh,d]
    num = jnp.einsum('bhsd,bhde->bhse', q, kv)
    den = jnp.einsum('bhsd,bhd->bhs', q, k_sum)[..., None]
    ctx = num / (den + EPS)                                      # [B,nh,S,d]
    return ctx.transpose(0, 2, 1, 3).reshape(B, S, H)


if __name__ == "__main__":
    key = jax.random.PRNGKey(0)
    keys = jax.random.split(key, 7)

    # deterministic parameter init (nn.Linear-like fan_in scaling)
    bound = 1.0 / math.sqrt(HIDDEN)
    x = jax.random.normal(keys[0], (BATCH, SEQ, HIDDEN), dtype=jnp.float32)
    wq = jax.random.uniform(keys[1], (HIDDEN, HIDDEN), jnp.float32, -bound, bound)
    wk = jax.random.uniform(keys[2], (HIDDEN, HIDDEN), jnp.float32, -bound, bound)
    wv = jax.random.uniform(keys[3], (HIDDEN, HIDDEN), jnp.float32, -bound, bound)
    bq = jax.random.uniform(keys[4], (HIDDEN,), jnp.float32, -bound, bound)
    bk = jax.random.uniform(keys[5], (HIDDEN,), jnp.float32, -bound, bound)
    bv = jax.random.uniform(keys[6], (HIDDEN,), jnp.float32, -bound, bound)

    # one-time weight / mask preparation ("model setup"), not per-call
    w3, b3, mask4 = jax.block_until_ready(prepare_params(wq, bq, wk, bk, wv, bv))

    out = kernel_self_attention(x, w3, b3, mask4)
    out = jax.block_until_ready(out)

    ref = reference_jax(x, wq, bq, wk, bk, wv, bv)
    assert out.shape == (BATCH, SEQ, HIDDEN)
    assert jnp.allclose(out, ref, atol=1e-4, rtol=1e-4), "mismatch vs reference"

    print("KERNEL_OK")
</pallas_src>

<mosaic_0001>
module attributes {stable_mosaic.version = 11 : i64} {
  func.func @kernel_self_attention_kernel(%arg0: i32, %arg1: memref<16x32xf32, #tpu.memory_space<vmem>>, %arg2: memref<3x32x32xf32, #tpu.memory_space<vmem>>, %arg3: memref<3x1x32xf32, #tpu.memory_space<vmem>>, %arg4: memref<32x128xf32, #tpu.memory_space<vmem>>, %arg5: memref<16x32xf32, #tpu.memory_space<vmem>>) attributes {dimension_semantics = [#tpu.dimension_semantics<parallel>], iteration_bounds = array<i64: 1>, scalar_prefetch = 0 : i64, scratch_operands = 0 : i64, tpu.core_type = #tpu.core_type<tc>, window_params = [{transform_indices = @transform_0, window_bounds = array<i64: 16, 32>}, {pipeline_mode = #tpu.pipeline_mode<synchronous>, transform_indices = @transform_1, window_bounds = array<i64: 3, 32, 32>}, {pipeline_mode = #tpu.pipeline_mode<synchronous>, transform_indices = @transform_2, window_bounds = array<i64: 3, 1, 32>}, {pipeline_mode = #tpu.pipeline_mode<synchronous>, transform_indices = @transform_3, window_bounds = array<i64: 32, 128>}, {transform_indices = @transform_4, window_bounds = array<i64: 16, 32>}]} {
    %c0 = arith.constant 0 : index
    %c0_0 = arith.constant 0 : index
    %0 = vector.load %arg1[%c0, %c0_0] : memref<16x32xf32, #tpu.memory_space<vmem>>, vector<16x32xf32>
    %c0_1 = arith.constant 0 : index
    %c0_2 = arith.constant 0 : index
    %c0_3 = arith.constant 0 : index
    %1 = vector.load %arg2[%c0_1, %c0_2, %c0_3] : memref<3x32x32xf32, #tpu.memory_space<vmem>>, vector<1x32x32xf32>
    %2 = vector.shape_cast %1 : vector<1x32x32xf32> to vector<32x32xf32>
    %cst = arith.constant dense<0.000000e+00> : vector<16x32xf32>
    %3 = tpu.matmul %0, %2, %cst {dimension_numbers = #tpu.dot_dimension_numbers<[1], [0], [0], [1], [0, 0, 1, 1], [], []>} : vector<16x32xf32>, vector<32x32xf32>, vector<16x32xf32> -> vector<16x32xf32>
    %c0_4 = arith.constant 0 : index
    %c0_5 = arith.constant 0 : index
    %c0_6 = arith.constant 0 : index
    %4 = vector.load %arg3[%c0_4, %c0_5, %c0_6] : memref<3x1x32xf32, #tpu.memory_space<vmem>>, vector<1x1x32xf32>
    %5 = vector.shape_cast %4 : vector<1x1x32xf32> to vector<1x32xf32>
    %6 = vector.broadcast %5 : vector<1x32xf32> to vector<16x32xf32>
    %7 = arith.addf %3, %6 : vector<16x32xf32>
    %cst_7 = arith.constant 0.000000e+00 : f32
    %8 = vector.broadcast %cst_7 : f32 to vector<16x32xf32>
    %9 = arith.cmpf ogt, %7, %8 : vector<16x32xf32>
    %cst_8 = arith.constant 1.000000e+00 : f32
    %10 = vector.broadcast %cst_8 : f32 to vector<16x32xf32>
    %11 = arith.addf %7, %10 : vector<16x32xf32>
    %cst_9 = arith.constant 0.000000e+00 : f32
    %12 = vector.broadcast %cst_9 : f32 to vector<16x32xf32>
    %13 = arith.minimumf %7, %12 : vector<16x32xf32>
    %14 = math.exp %13 : vector<16x32xf32>
    %15 = arith.select %9, %11, %14 : vector<16x32xi1>, vector<16x32xf32>
    %c1 = arith.constant 1 : index
    %c0_10 = arith.constant 0 : index
    %c0_11 = arith.constant 0 : index
    %16 = vector.load %arg2[%c1, %c0_10, %c0_11] : memref<3x32x32xf32, #tpu.memory_space<vmem>>, vector<1x32x32xf32>
    %17 = vector.shape_cast %16 : vector<1x32x32xf32> to vector<32x32xf32>
    %cst_12 = arith.constant dense<0.000000e+00> : vector<16x32xf32>
    %18 = tpu.matmul %0, %17, %cst_12 {dimension_numbers = #tpu.dot_dimension_numbers<[1], [0], [0], [1], [0, 0, 1, 1], [], []>} : vector<16x32xf32>, vector<32x32xf32>, vector<16x32xf32> -> vector<16x32xf32>
    %c1_13 = arith.constant 1 : index
    %c0_14 = arith.constant 0 : index
    %c0_15 = arith.constant 0 : index
    %19 = vector.load %arg3[%c1_13, %c0_14, %c0_15] : memref<3x1x32xf32, #tpu.memory_space<vmem>>, vector<1x1x32xf32>
    %20 = vector.shape_cast %19 : vector<1x1x32xf32> to vector<1x32xf32>
    %21 = vector.broadcast %20 : vector<1x32xf32> to vector<16x32xf32>
    %22 = arith.addf %18, %21 : vector<16x32xf32>
    %cst_16 = arith.constant 0.000000e+00 : f32
    %23 = vector.broadcast %cst_16 : f32 to vector<16x32xf32>
    %24 = arith.cmpf ogt, %22, %23 : vector<16x32xf32>
    %cst_17 = arith.constant 1.000000e+00 : f32
    %25 = vector.broadcast %cst_17 : f32 to vector<16x32xf32>
    %26 = arith.addf %22, %25 : vector<16x32xf32>
    %cst_18 = arith.constant 0.000000e+00 : f32
    %27 = vector.broadcast %cst_18 : f32 to vector<16x32xf32>
    %28 = arith.minimumf %22, %27 : vector<16x32xf32>
    %29 = math.exp %28 : vector<16x32xf32>
    %30 = arith.select %24, %26, %29 : vector<16x32xi1>, vector<16x32xf32>
    %c2 = arith.constant 2 : index
    %c0_19 = arith.constant 0 : index
    %c0_20 = arith.constant 0 : index
    %31 = vector.load %arg2[%c2, %c0_19, %c0_20] : memref<3x32x32xf32, #tpu.memory_space<vmem>>, vector<1x32x32xf32>
    %32 = vector.shape_cast %31 : vector<1x32x32xf32> to vector<32x32xf32>
    %cst_21 = arith.constant dense<0.000000e+00> : vector<16x32xf32>
    %33 = tpu.matmul %0, %32, %cst_21 {dimension_numbers = #tpu.dot_dimension_numbers<[1], [0], [0], [1], [0, 0, 1, 1], [], []>} : vector<16x32xf32>, vector<32x32xf32>, vector<16x32xf32> -> vector<16x32xf32>
    %c2_22 = arith.constant 2 : index
    %c0_23 = arith.constant 0 : index
    %c0_24 = arith.constant 0 : index
    %34 = vector.load %arg3[%c2_22, %c0_23, %c0_24] : memref<3x1x32xf32, #tpu.memory_space<vmem>>, vector<1x1x32xf32>
    %35 = vector.shape_cast %34 : vector<1x1x32xf32> to vector<1x32xf32>
    %36 = vector.broadcast %35 : vector<1x32xf32> to vector<16x32xf32>
    %37 = arith.addf %33, %36 : vector<16x32xf32>
    %cst_25 = arith.constant 1.000000e+00 : f32
    %38 = vector.broadcast %cst_25 : f32 to vector<8x32xf32>
    %39 = vector.extract_strided_slice %30 {offsets = [0, 0], sizes = [8, 32], strides = [1, 1]} : vector<16x32xf32> to vector<8x32xf32>
    %40 = vector.extract_strided_slice %37 {offsets = [0, 0], sizes = [8, 32], strides = [1, 1]} : vector<16x32xf32> to vector<8x32xf32>
    %41 = tpu.concatenate %40, %38 in 1 : vector<8x32xf32>, vector<8x32xf32> -> vector<8x64xf32>
    %cst_26 = arith.constant dense<0.000000e+00> : vector<32x64xf32>
    %42 = tpu.matmul %39, %41, %cst_26 {dimension_numbers = #tpu.dot_dimension_numbers<[0], [0], [1], [1], [0, 1, 1, 1], [], []>} : vector<8x32xf32>, vector<8x64xf32>, vector<32x64xf32> -> vector<32x64xf32>
    %43 = vector.extract_strided_slice %30 {offsets = [8, 0], sizes = [8, 32], strides = [1, 1]} : vector<16x32xf32> to vector<8x32xf32>
    %44 = vector.extract_strided_slice %37 {offsets = [8, 0], sizes = [8, 32], strides = [1, 1]} : vector<16x32xf32> to vector<8x32xf32>
    %45 = tpu.concatenate %44, %38 in 1 : vector<8x32xf32>, vector<8x32xf32> -> vector<8x64xf32>
    %cst_27 = arith.constant dense<0.000000e+00> : vector<32x64xf32>
    %46 = tpu.matmul %43, %45, %cst_27 {dimension_numbers = #tpu.dot_dimension_numbers<[0], [0], [1], [1], [0, 1, 1, 1], [], []>} : vector<8x32xf32>, vector<8x64xf32>, vector<32x64xf32> -> vector<32x64xf32>
    %47 = tpu.concatenate %42, %46 in 1 : vector<32x64xf32>, vector<32x64xf32> -> vector<32x128xf32>
    %c0_28 = arith.constant 0 : index
    %c0_29 = arith.constant 0 : index
    %48 = vector.load %arg4[%c0_28, %c0_29] : memref<32x128xf32, #tpu.memory_space<vmem>>, vector<32x128xf32>
    %49 = arith.mulf %47, %48 : vector<32x128xf32>
    %cst_30 = arith.constant dense<0.000000e+00> : vector<16x128xf32>
    %50 = tpu.matmul %15, %49, %cst_30 {dimension_numbers = #tpu.dot_dimension_numbers<[1], [0], [0], [1], [0, 0, 1, 1], [], []>} : vector<16x32xf32>, vector<32x128xf32>, vector<16x128xf32> -> vector<16x128xf32>
    %51 = vector.extract_strided_slice %50 {offsets = [0, 0], sizes = [8, 32], strides = [1, 1]} : vector<16x128xf32> to vector<8x32xf32>
    %52 = vector.extract_strided_slice %50 {offsets = [0, 32], sizes = [8, 32], strides = [1, 1]} : vector<16x128xf32> to vector<8x32xf32>
    %cst_31 = arith.constant 9.99999997E-7 : f32
    %53 = vector.broadcast %cst_31 : f32 to vector<8x32xf32>
    %54 = arith.addf %52, %53 : vector<8x32xf32>
    %55 = arith.divf %51, %54 : vector<8x32xf32>
    %c0_32 = arith.constant 0 : index
    %c0_33 = arith.constant 0 : index
    %56 = vector.load %arg5[%c0_32, %c0_33] : memref<16x32xf32, #tpu.memory_space<vmem>>, vector<8x32xf32>
    tpu.vector_store %arg5[%c0_32, %c0_33], %55 {strides = array<i32>} : memref<16x32xf32, #tpu.memory_space<vmem>>, vector<8x32xf32>,
    %57 = vector.extract_strided_slice %50 {offsets = [8, 64], sizes = [8, 32], strides = [1, 1]} : vector<16x128xf32> to vector<8x32xf32>
    %58 = vector.extract_strided_slice %50 {offsets = [8, 96], sizes = [8, 32], strides = [1, 1]} : vector<16x128xf32> to vector<8x32xf32>
    %cst_34 = arith.constant 9.99999997E-7 : f32
    %59 = vector.broadcast %cst_34 : f32 to vector<8x32xf32>
    %60 = arith.addf %58, %59 : vector<8x32xf32>
    %61 = arith.divf %57, %60 : vector<8x32xf32>
    %c8 = arith.constant 8 : index
    %c0_35 = arith.constant 0 : index
    %62 = vector.load %arg5[%c8, %c0_35] : memref<16x32xf32, #tpu.memory_space<vmem>>, vector<8x32xf32>
    tpu.vector_store %arg5[%c8, %c0_35], %61 {strides = array<i32>} : memref<16x32xf32, #tpu.memory_space<vmem>>, vector<8x32xf32>,
    return
  }
  func.func @transform_0(%arg0: i32) -> (i32, i32) {
    %c0_i32 = arith.constant 0 : i32
    %c0_i32_0 = arith.constant 0 : i32
    return %arg0, %c0_i32 : i32, i32
  }
  func.func @transform_1(%arg0: i32) -> (i32, i32, i32) {
    %c0_i32 = arith.constant 0 : i32
    %c0_i32_0 = arith.constant 0 : i32
    %c0_i32_1 = arith.constant 0 : i32
    %c0_i32_2 = arith.constant 0 : i32
    return %c0_i32, %c0_i32_0, %c0_i32_1 : i32, i32, i32
  }
  func.func @transform_2(%arg0: i32) -> (i32, i32, i32) {
    %c0_i32 = arith.constant 0 : i32
    %c0_i32_0 = arith.constant 0 : i32
    %c0_i32_1 = arith.constant 0 : i32
    %c0_i32_2 = arith.constant 0 : i32
    return %c0_i32, %c0_i32_0, %c0_i32_1 : i32, i32, i32
  }
  func.func @transform_3(%arg0: i32) -> (i32, i32) {
    %c0_i32 = arith.constant 0 : i32
    %c0_i32_0 = arith.constant 0 : i32
    %c0_i32_1 = arith.constant 0 : i32
    return %c0_i32, %c0_i32_0 : i32, i32
  }
  func.func @transform_4(%arg0: i32) -> (i32, i32) {
    %c0_i32 = arith.constant 0 : i32
    %c0_i32_0 = arith.constant 0 : i32
    return %arg0, %c0_i32 : i32, i32
  }
}

</mosaic_0001>

<bundles_post_ra>
// kernel: tpu_custom_call.1
= control target key start
LH: loop header
LB: loop body
LE: loop exit
PB: predicated region body
PF: predicated region fallthrough
CT: control target
= control target key end

     0   :  { %9 = vsyncpa [#allocation3], 0  ;;  %s1168_s0 = inlined_call_operand.hbm [shape: f32[16,32], index: 0, kind: input, shape index: {}]   ;;  %s1169_s1 = inlined_call_operand.hbm [shape: f32[3,32,32], index: 1, kind: input, shape index: {}]   ;;  %s1170_s2 = inlined_call_operand.vmem [shape: f32[3,1,32], index: 2, kind: input, shape index: {}]   ;;  %s1171_s3 = inlined_call_operand.hbm [shape: f32[32,128], index: 3, kind: input, shape index: {}]   ;;  %s1172_s4 = inlined_call_operand.hbm [shape: f32[16,32], index: 4, kind: output, shape index: {}]  }
   0x1   :  { %10 = vsyncpa [#allocation6], 0 }
   0x2   :  { %11 = vsyncpa [#allocation4], 0  ;;  %s1025_s15 = smov [#allocation5]   ;;  %s1026_s17 = smov [#allocation2]  }
   0x3   :  { %s29_s16 = sshll.u32 %s1025_s15, 4  ;;  %s17_s18 = sshll.u32 %s1026_s17, 4  ;;  %s30_s16 = int_to_ptr.vmem [resolvable:$true] %s29_s16  ;;  %s1058_s18 = int_to_ptr.vmem [resolvable:$true] %s17_s18 }
   0x4   :  { %s931_s21 = scalar_lea.hbm %s1169_s1, 1536 }
   0x5   :  { %p932_p0 = scmp.ne.s32.totalorder %s1169_s1, %s931_s21  ;;  %p935_p1 = scmp.lt.u32.totalorder %s931_s21, %s1169_s1 }
   0x7   :  { %p937_p2 = pnand %p935_p1, %p932_p0 }
   0x9   :  { %940 = shalt.err (!%p937_p2)
}
   0xa   :  { %s941_s26 = scalar_lea.vmem %s30_s16, 1536  ;;  %p946_p4 = scmp.lt.s32.totalorder %s30_s16, %s30_s16 }
   0xb   :  { %p942_p3 = scmp.ne.s32.totalorder %s30_s16, %s941_s26  ;;  %p947_p5 = scmp.lt.s32.totalorder %s941_s26, %s941_s26 }
   0xd   :  { %p948_p6 = por %p947_p5, %p946_p4 }
   0xf   :  { %p949_p7 = pnand %p948_p6, %p942_p3 }
  0x11   :  { %952 = shalt.err (!%p949_p7)
}
  0x12   :  { %s1027_s27 = smov 128   ;;  %s1028_s28 = smov 8  }
  0x13   :  { %35 = dma.hbm_to_vmem [thread:$0]  %s1169_s1, 1536, %s30_s16, [#allocation6], %s1027_s27, %s1027_s27, %s1028_s28  }
  0x14   :  { %s953_s7 = scalar_lea.hbm %s1168_s0, 256 }
  0x15   :  { %p954_p8 = scmp.ne.s32.totalorder %s1168_s0, %s953_s7  ;;  %p957_p9 = scmp.lt.u32.totalorder %s953_s7, %s1168_s0 }
  0x17   :  { %p959_p10 = pnand %p957_p9, %p954_p8 }
  0x19   :  { %962 = shalt.err (!%p959_p10)
}
  0x1a   :  { %s963_s12 = scalar_lea.vmem %s1058_s18, 256  ;;  %p968_p12 = scmp.lt.s32.totalorder %s1058_s18, %s1058_s18 }
  0x1b   :  { %p964_p11 = scmp.ne.s32.totalorder %s1058_s18, %s963_s12  ;;  %p969_p13 = scmp.lt.s32.totalorder %s963_s12, %s963_s12 }
  0x1d   :  { %p970_p0 = por %p969_p13, %p968_p12 }
  0x1f   :  { %p971_p1 = pnand %p970_p0, %p964_p11 }
  0x21   :  { %974 = shalt.err (!%p971_p1)
}
  0x22   :  { %23 = dma.hbm_to_vmem [thread:$0]  %s1168_s0, 256, %s1058_s18, [#allocation3], %s1027_s27, %s1027_s27, %s1028_s28  }
  0x23   :  { %s1029_s14 = smov [#allocation7]   ;;  %s975_s19 = scalar_lea.hbm %s1171_s3, 512 }
  0x24   :  { %s43_s15 = sshll.u32 %s1029_s14, 4  ;;  %p976_p2 = scmp.ne.s32.totalorder %s1171_s3, %s975_s19  ;;  %s44_s15 = int_to_ptr.vmem [resolvable:$true] %s43_s15 }
  0x25   :  { %p979_p3 = scmp.lt.u32.totalorder %s975_s19, %s1171_s3 }
  0x27   :  { %p981_p4 = pnand %p979_p3, %p976_p2 }
  0x29   :  { %984 = shalt.err (!%p981_p4)
}
  0x2a   :  { %s985_s24 = scalar_lea.vmem %s44_s15, 512  ;;  %p990_p6 = scmp.lt.s32.totalorder %s44_s15, %s44_s15 }
  0x2b   :  { %p986_p5 = scmp.ne.s32.totalorder %s44_s15, %s985_s24  ;;  %p991_p7 = scmp.lt.s32.totalorder %s985_s24, %s985_s24 }
  0x2d   :  { %p992_p8 = por %p991_p7, %p990_p6 }
  0x2f   :  { %p993_p9 = pnand %p992_p8, %p986_p5 }
  0x31   :  { %996 = shalt.err (!%p993_p9)
}
  0x32   :  { %49 = dma.hbm_to_vmem [thread:$0]  %s1171_s3, 512, %s44_s15, [#allocation6], %s1027_s27, %s1027_s27, %s1028_s28  }
  0x33   :  { %1019 = dma.done.wait [#allocation3], 256  }
  0x34   :  { %1020 = vsyncadd [#allocation3], 4294967040 }
  0x35   :  { %1021 = dma.done.wait [#allocation6], 2048  }
  0x36   :  { %1022 = vsyncadd [#allocation6], 4294965248  ;;  %vm72_vm0 = vcmask 261120   ;;  %v167_v0 = vld [vmem:[#allocation5 + $0x20] sm:$0xff]  ;;  %v168_v1 = vld [vmem:[#allocation5 + $0x28] sm:$0xff]  ;;  %vm387_vm3 = vcmask 64512  }
  0x37   :  { %v169_v2 = vld [vmem:[#allocation5 + $0x30] sm:$0xff]  ;;  %v886_v3 = vpack.c.bf16 %v168_v1, %v167_v0  ;;  %v170_v4 = vld [vmem:[#allocation5 + $0x38] sm:$0xff]  ;;  %v61_v7 = vld [vmem:[#allocation5] sm:$0xff]  ;;  %vm631_vm5 = vcmask 523264   ;;  %s1031_s6 = smov 96   ;;  %s1032_s7 = smov [#allocation8]  }
  0x38   :  { %v59_v5 = vld [vmem:[#allocation2] sm:$0xff]  ;;  %v890_v6 = vpack.c.bf16 %v170_v4, %v169_v2  ;;  %v62_v8 = vld [vmem:[#allocation5 + $0x8] sm:$0xff]  ;;  %v64_v11 = vld [vmem:[#allocation5 + $0x18] sm:$0xff]  ;;  %s750_s8 = sshll.u32 %s1032_s7, 4  ;;  %s751_s8 = int_to_ptr.vmem [resolvable:$true] %s750_s8 }
  0x39   :  { %837 = vmatprep.mubr.msk.f32.mxu1 %vm72_vm0, %v59_v5  ;;  %v63_v9 = vld [vmem:[#allocation5 + $0x10] sm:$0xff]  ;;  %826 = vmatprep.mubr.msk.f32.mxu0 %vm72_vm0, %v59_v5  ;;  %v878_v10 = vpack.c.bf16 %v62_v8, %v61_v7  ;;  %v267_v13 = vld [vmem:[#allocation5 + $0x40] sm:$0xff]  ;;  %v268_v14 = vld [vmem:[#allocation5 + $0x48] sm:$0xff]  ;;  %s997_s9 = scalar_lea.vmem %s751_s8, 256  ;;  %p1002_p11 = scmp.lt.s32.totalorder %s751_s8, %s751_s8 }
  0x3a   :  { %887 = vmatprep.subr.bf16.mxu1 %v886_v3  ;;  %v882_v12 = vpack.c.bf16 %v64_v11, %v63_v9  ;;  %v894_v15 = vpack.c.bf16 %v268_v14, %v267_v13  ;;  %v60_v16 = vld [vmem:[#allocation2 + $0x8] sm:$0xff]  ;;  %v269_v17 = vld [vmem:[#allocation5 + $0x50] sm:$0xff]  ;;  %v637_v7 = vld [vmem:[#allocation7 + $0x8] sm:$0xff]  ;;  %p998_p10 = scmp.ne.s32.totalorder %s751_s8, %s997_s9  ;;  %p1003_p12 = scmp.lt.s32.totalorder %s997_s9, %s997_s9 }
  0x3b   :  { %889 = vmatpush3.bf16.msra.mxu1 %v886_v3  ;;  %879 = vmatprep.subr.bf16.mxu0 %v878_v10  ;;  %v270_v18 = vld [vmem:[#allocation5 + $0x58] sm:$0xff]  ;;  %v767_v20 = vld [vmem:[%s1170_s2 + $0x1] ss:$0 sm:$0xff]  ;;  %v763_v22 = vld [vmem:[%s1170_s2] ss:$0 sm:$0xff] }
  0x3c   :  { %891 = vmatprep.subr.bf16.mxu1 %v890_v6  ;;  %881 = vmatpush3.bf16.msra.mxu0 %v878_v10  ;;  %v898_v19 = vpack.c.bf16 %v270_v18, %v269_v17  ;;  %v771_v34 = vld [vmem:[%s1170_s2 + $0x2] ss:$0 sm:$0xff]  ;;  %s1030_s2 = smov 64   ;;  %v636_v8 = vld [vmem:[#allocation7] sm:$0xff]  ;;  %v639_v18 = vld [vmem:[#allocation7 + $0x18] sm:$0xff]  ;;  %p1004_p13 = por %p1003_p12, %p1002_p11 }
  0x3d   :  { %883 = vmatprep.subr.bf16.mxu0 %v882_v12  ;;  %v638_v17 = vld [vmem:[#allocation7 + $0x10] sm:$0xff] }
  0x3e   :  { %p1005_p0 = pnand %p1004_p13, %p998_p10 }
  0x3f   :  { %893 = vmatpush3.bf16.msra.mxu1 %v890_v6 }
  0x40   :  { %885 = vmatpush3.bf16.msra.mxu0 %v882_v12 }
  0x41   :  { %895 = vmatprep.subr.bf16.mxu0 %v894_v15 }
  0x42   :  { %838 = vmatmul.mubr.msk.f32.vlgmr.msra.gmra.mrb[0].mxu1 %vm72_vm0, %v60_v16 }
  0x43   :  { %827 = vmatmul.mubr.msk.f32.vlgmr.msra.gmra.mrb[0].mxu0 %vm72_vm0, %v60_v16 }
  0x44   :  { %897 = vmatpush3.bf16.msra.mxu0 %v894_v15  ;;  %848 = vmatprep.mubr.msk.f32.mxu0 %vm72_vm0, %v59_v5 }
  0x45   :  { %899 = vmatprep.subr.bf16.mxu0 %v898_v19 }
  0x48   :  { %901 = vmatpush3.bf16.msra.mxu0 %v898_v19 }
  0x4b   :  { %849 = vmatmul.mubr.msk.f32.vlgmr.msra.gmra.mrb[2].mxu0 %vm72_vm0, %v60_v16 }
 0x115   :  { %v839_v21 = vpop.f32.mrb[0].mxu1 }
 0x116   :  { %v251_v23 = vadd.f32 %v839_v21, %v767_v20  ;;  %v245_v24 = vpop.f32.mrb[1].mxu1  ;;  %v828_v25 = vpop.f32.mrb[0].mxu0 }
 0x117   :  { %v1122_v27 = vadd.f32 %v828_v25, %v763_v22  ;;  %v145_v28 = vpop.f32.mrb[1].mxu0  ;;  %v246_v30 = vadd.f32 %v767_v20, %v245_v24 }
 0x118   :  { %v259_v26 = vmin.f32 %v251_v23, 0.0  ;;  %v257_v38 = vadd.f32 1.0, %v251_v23  ;;  %vm255_vm1 = vcmp.gt.f32.partialorder %v251_v23, 0.0  ;;  %v146_v47 = vadd.f32 %v763_v22, %v145_v28 }
 0x119   :  { %v258_v31 = vmin.f32 %v246_v30, 0.0  ;;  %v256_v44 = vadd.f32 1.0, %v246_v30  ;;  %vm254_vm2 = vcmp.gt.f32.partialorder %v246_v30, 0.0  ;;  %v159_v5 = vmin.f32 %v1122_v27, 0.0 }
 0x11a   :  { %v262_v29 = vmul.f32 1.442695, %v259_v26  ;;  %v158_v49 = vmin.f32 %v146_v47, 0.0  ;;  %v156_v56 = vadd.f32 1.0, %v146_v47  ;;  %vm154_vm4 = vcmp.gt.f32.partialorder %v146_v47, 0.0 }
 0x11b   :  { %v260_v35 = vmul.f32 1.442695, %v258_v31  ;;  %v162_v10 = vmul.f32 1.442695, %v159_v5  ;;  %v157_v24 = vadd.f32 1.0, %v1122_v27  ;;  %vm155_vm6 = vcmp.gt.f32.partialorder %v1122_v27, 0.0 }
 0x11c   :  { %919 = vpow2.f32 %v262_v29  ;;  %v160_v51 = vmul.f32 1.442695, %v158_v49 }
 0x11d   :  { %921 = vpow2.f32 %v260_v35 }
 0x11e   :  { %v850_v32 = vpop.f32.mrb[2].mxu0  ;;  %923 = vpow2.f32 %v160_v51 }
 0x11f   :  { %v345_v33 = vpop.f32.mrb[3].mxu0  ;;  %v351_v36 = vadd.f32 %v850_v32, %v771_v34  ;;  %925 = vpow2.f32 %v162_v10 }
 0x120   :  { %v346_v37 = vadd.f32 %v771_v34, %v345_v33 }
 0x121   :  { %v485_v42 = vsel %vm72_vm0, %v351_v36, 1.0 }
 0x122   :  { %v354_v41 = vsel %vm72_vm0, %v346_v37, 1.0  ;;  %859 = vmatprep.subr.mxu0 %v485_v42 }
 0x123   :  { %851 = vmatprep.subr.mxu1 %v354_v41  ;;  %860 = vmatpush3.msra.mxu0 %v485_v42 }
 0x124   :  { %852 = vmatpush3.msra.mxu1 %v354_v41 }
 0x126   :  { %v920_v39 = vpop.eup %919 }
 0x127   :  { %v265_v40 = vsel %vm255_vm1, %v257_v38, %v920_v39  ;;  %v922_v43 = vpop.eup %921 }
 0x128   :  { %486 = vxpose.xlu0.b32.start.end [1/1] (short) (narrow) %v265_v40, 32  ;;  %v264_v45 = vsel %vm254_vm2, %v256_v44, %v922_v43  ;;  %v924_v57 = vpop.eup %923 }
 0x129   :  { %v164_v59 = vsel %vm154_vm4, %v156_v56, %v924_v57  ;;  %v926_v25 = vpop.eup %925 }
 0x12a   :  { %v165_v26 = vsel %vm155_vm6, %v157_v24, %v926_v25 }
 0x135   :  { %355 = vxpose.xlu0.b32.start.end [1/1] (short) (narrow) %v264_v45, 32 }
 0x1a8   :  { %v502_v46 = vpop.trf.xlu0 }
 0x1a9   :  { %861 = vmatprep.mubr.msk.f32.mxu0 %vm387_vm3, %v502_v46 }
 0x1ac   :  { %v503_v48 = vpop.trf.xlu0 }
 0x1ad   :  { %862 = vmatmul.mubr.msk.f32.vlgmr.msra.gmra.mrb[4].mxu0 %vm387_vm3, %v503_v48 }
 0x1b0   :  { %v504_v50 = vpop.trf.xlu0 }
 0x1b1   :  { %864 = vmatprep.mubr.msk.f32.mxu0 %vm387_vm3, %v504_v50 }
 0x1b4   :  { %v505_v52 = vpop.trf.xlu0 }
 0x1b5   :  { %865 = vmatmul.mubr.msk.f32.gmra.mrb[6].mxu0 %vm387_vm3, %v505_v52 }
 0x1b8   :  { %v371_v53 = vpop.trf.xlu0 }
 0x1b9   :  { %853 = vmatprep.mubr.msk.f32.mxu1 %vm387_vm3, %v371_v53 }
 0x1bc   :  { %v372_v54 = vpop.trf.xlu0 }
 0x1bd   :  { %854 = vmatmul.mubr.msk.f32.vlgmr.msra.gmra.mrb[2].mxu1 %vm387_vm3, %v372_v54 }
 0x1c0   :  { %v373_v55 = vpop.trf.xlu0 }
 0x1c1   :  { %856 = vmatprep.mubr.msk.f32.mxu1 %vm387_vm3, %v373_v55 }
 0x1c4   :  { %v374_v58 = vpop.trf.xlu0 }
 0x1c5   :  { %857 = vmatmul.mubr.msk.f32.gmra.mrb[4].mxu1 %vm387_vm3, %v374_v58 }
 0x1c6   :  { %875 = vmatprep.mubr.msk.f32.mxu1 %vm72_vm0, %v164_v59 }
 0x280   :  { %v863_v60 = vpop.f32.mrb[4].mxu0 }
 0x281   :  { %621 = vrot.lane.b32.xlu1 %v863_v60, %s1030_s2  ;;  %v596_v61 = vpop.f32.mrb[5].mxu0 }
 0x285   :  { %619 = vrot.lane.b32.xlu1 %v596_v61, %s1030_s2 }
 0x288   :  { %v866_v62 = vpop.f32.mrb[6].mxu0 }
 0x289   :  { %v606_v63 = vpop.f32.mrb[7].mxu0 }
 0x28a   :  { %623 = vrot.lane.b32.xlu1 %v606_v63, %s1030_s2 }
 0x28e   :  { %625 = vrot.lane.b32.xlu1 %v866_v62, %s1030_s2 }
 0x290   :  { %v855_v0 = vpop.f32.mrb[2].mxu1 }
 0x291   :  { %v466_v1 = vpop.f32.mrb[3].mxu1 }
 0x298   :  { %v858_v2 = vpop.f32.mrb[4].mxu1 }
 0x299   :  { %v476_v3 = vpop.f32.mrb[5].mxu1 }
 0x2f3   :  { %v622_v4 = vpop.permute.xlu1 %621 }
 0x2f4   :  { %v633_v6 = vsel %vm631_vm5, %v855_v0, %v622_v4 }
 0x2f5   :  { %v641_v12 = vmul.f32 %v637_v7, %v633_v6 }
 0x2f7   :  { %v620_v9 = vpop.permute.xlu1 %619 }
 0x2f8   :  { %v632_v11 = vsel %vm631_vm5, %v466_v1, %v620_v9 }
 0x2f9   :  { %v640_v13 = vmul.f32 %v636_v8, %v632_v11 }
 0x2fb   :  { %v902_v14 = vpack.c.bf16 %v641_v12, %v640_v13 }
 0x2fc   :  { %v624_v15 = vpop.permute.xlu1 %623 }
 0x2fd   :  { %903 = vmatprep.subr.bf16.mxu1 %v902_v14  ;;  %v634_v16 = vsel %vm631_vm5, %v476_v3, %v624_v15 }
 0x2fe   :  { %905 = vmatpush3.bf16.msra.mxu1 %v902_v14  ;;  %v642_v21 = vmul.f32 %v638_v17, %v634_v16 }
 0x300   :  { %v626_v19 = vpop.permute.xlu1 %625 }
 0x301   :  { %v635_v20 = vsel %vm631_vm5, %v858_v2, %v626_v19 }
 0x302   :  { %v643_v22 = vmul.f32 %v639_v18, %v635_v20 }
 0x304   :  { %v906_v23 = vpack.c.bf16 %v643_v22, %v642_v21 }
 0x306   :  { %907 = vmatprep.subr.bf16.mxu1 %v906_v23 }
 0x307   :  { %909 = vmatpush3.bf16.msra.mxu1 %v906_v23 }
 0x30a   :  { %876 = vmatmul.mubr.msk.f32.vlgmr.msra.gmra.mrb[6].mxu1 %vm72_vm0, %v165_v26 }
 0x3dd   :  { %v877_v28 = vpop.f32.mrb[6].mxu1 }
 0x3de   :  { %v733_v29 = vadd.f32 1e-06, %v877_v28  ;;  %v716_v30 = vpop.f32.mrb[7].mxu1 }
 0x3df   :  { %v725_v31 = vadd.f32 1e-06, %v716_v30 }
 0x3e0   :  { %735 = vrot.lane.b32.xlu1 %v733_v29, %s1031_s6 }
 0x3e1   :  { %727 = vrot.lane.b32.xlu0 %v725_v31, %s1031_s6 }
 0x452   :  { %v736_v32 = vpop.permute.xlu1 %735 }
 0x453   :  { %927 = vrcp.f32 %v736_v32  ;;  %v728_v33 = vpop.permute.xlu0 %727 }
 0x454   :  { %929 = vrcp.f32 %v728_v33 }
 0x45d   :  { %v928_v34 = vpop.eup %927 }
 0x45e   :  { %v930_v35 = vpop.eup %929  ;;  %v739_v36 = vmul.f32 %v928_v34, %v877_v28 }
 0x45f   :  { %v731_v27 = vmul.f32 %v930_v35, %v716_v30 }
 0x460   :  { %741 = vrot.lane.b32.xlu1 %v739_v36, %s1030_s2 }
 0x461   :  { %732 = vst.msk [vmem:[#allocation8] sm:$0xff] %vm72_vm0, %v731_v27 }
 0x4d2   :  { %v742_v37 = vpop.permute.xlu1 %741 }
 0x4d3   :  { %744 = vst.msk [vmem:[#allocation8 + $0x8] sm:$0xff] %vm72_vm0, %v742_v37 }
 0x4d4   :  { %1008 = shalt.err (!%p1005_p0)
}
 0x4d5   :  { %s1009_s12 = scalar_lea.hbm %s1172_s4, 256 }
 0x4d6   :  { %p1010_p1 = scmp.ne.s32.totalorder %s1172_s4, %s1009_s12  ;;  %p1013_p2 = scmp.lt.u32.totalorder %s1009_s12, %s1172_s4 }
 0x4d8   :  { %p1015_p3 = pnand %p1013_p2, %p1010_p1 }
 0x4da   :  { %1018 = shalt.err (!%p1015_p3)
}
 0x4db   :  { %756 = dma.vmem_to_hbm [thread:$0]  %s751_s8, 256, %s1172_s4, [#allocation4], %s1027_s27, %s1027_s27, %s1028_s28  }
 0x4dc   :  { %1023 = dma.done.wait [#allocation4], 256  }
 0x4dd   :  { %1024 = vsyncadd [#allocation4], 4294967040 }
 0x4de   :  { %760 = vsyncpa [#allocation3], 1 }
 0x4df   :  { %761 = vsyncpa [#allocation6], 1 }
 0x4e0   :  { %762 = vsyncpa [#allocation4], 1 }

</bundles_post_ra>
